<compile_context>
chip_gen: v6e
topology: v6e:2x2x1
jax: 0.10.0
libtpu: 0.0.40
codegen_flags: <defaults>
</compile_context>

<pallas_src>
import functools

import jax
import jax.numpy as jnp
from jax.experimental import pallas as pl
from jax.experimental.pallas import tpu as pltpu

NEG_SLOPE = 0.01  # PyTorch F.leaky_relu default


def _leaky_relu(x):
    return jnp.where(x >= 0, x, NEG_SLOPE * x)


def _round_up(x, m):
    return (x + m - 1) // m * m


def _vmem_capacity_bytes():
    """Per-core VMEM capacity (conservative fallback = v7x's 64 MiB)."""
    try:
        info = pltpu.get_tpu_info()
        cap = getattr(info, "vmem_capacity_bytes", None)
        if cap:
            return int(cap)
    except Exception:
        pass
    return 64 << 20


def _pinsage_kernel(h_self_ref, h_nbr_ref, nbw_ref,
                    wq_t_ref, bq_ref, w1_t_ref, w2_t_ref, bw_ref,
                    out_ref):
    """One block of BN nodes.

    h_self_ref : (BN, Fp)      self embeddings                  (compute dtype)
    h_nbr_ref  : (T, BN, Fp)   neighbor embeddings, nbr-major   (compute dtype)
    nbw_ref    : (BN, T)       pre-normalized neighbor weights  (f32)
    wq_t_ref   : (Fp, Hp)      Q.weight^T                       (compute dtype)
    bq_ref     : (1, Hp)       Q.bias                           (f32)
    w1_t_ref   : (Fp, Op)      W.weight[:, :F]^T                (compute dtype)
    w2_t_ref   : (Hp, Op)      W.weight[:, F:]^T                (compute dtype)
    bw_ref     : (1, Op)       W.bias                           (f32)
    out_ref    : (BN, Op)      output                           (out dtype)
    """
    t, bn, _ = h_nbr_ref.shape
    hid = wq_t_ref.shape[1]

    wq = wq_t_ref[...]
    bq = bq_ref[...]
    nbw = nbw_ref[...]                                   # (BN, T) f32, sums to 1 (or 0)

    # Q(h_neighbors) + leaky_relu, then weighted sum over the T neighbor
    # chunks.  Each chunk is a static leading-dim view (no sublane reshape);
    # the aggregation is T pure-VPU fused multiply-adds.
    h_agg = jnp.zeros((bn, hid), jnp.float32)
    for k in range(t):                                   # static, T is small
        hq_k = jnp.dot(h_nbr_ref[k], wq,
                       preferred_element_type=jnp.float32) + bq
        hq_k = _leaky_relu(hq_k)                         # (BN, Hp) f32
        h_agg = h_agg + nbw[:, k:k + 1] * hq_k

    # W(cat([h_self, h_agg], 1)) == h_self @ W1^T + h_agg @ W2^T + b
    z = (jnp.dot(h_self_ref[...], w1_t_ref[...],
                 preferred_element_type=jnp.float32)
         + jnp.dot(h_agg.astype(w2_t_ref.dtype), w2_t_ref[...],
                   preferred_element_type=jnp.float32)
         + bw_ref[...])
    z = _leaky_relu(z)

    # Row L2-normalize with safediv (rsqrt on the EUP).
    ss = jnp.sum(z * z, axis=1, keepdims=True)
    ss = jnp.where(ss == 0.0, 1.0, ss)
    out_ref[...] = (z * jax.lax.rsqrt(ss)).astype(out_ref.dtype)


@functools.partial(jax.jit,
                   static_argnames=("block_nodes", "compute_dtype", "out_dtype"))
def pinsage_conv(h, nodeset, nb_nodes, nb_weights, params, *,
                 block_nodes=None, compute_dtype=jnp.bfloat16, out_dtype=None):
    """Pallas implementation of PinSageConv.forward.

    block_nodes  : optional cap on nodes per grid step (default: auto-sized so
        double-buffered data tiles use ~0.35x of the queried VMEM capacity).
    compute_dtype: dtype fed to the MXU (bf16 default; accumulation is f32).
        Pass jnp.float32 for near-bit-accurate results.
    out_dtype    : output storage dtype (default: compute_dtype, halving
        writeback on the bf16 path).  Pass jnp.float32 if the consumer needs it.
    """
    n_nodes, t = nb_nodes.shape
    f_in = h.shape[1]
    hid = params["wq"].shape[0]
    out_f = params["ww"].shape[0]

    if out_dtype is None:
        out_dtype = compute_dtype
    isz = jnp.dtype(compute_dtype).itemsize
    osz = jnp.dtype(out_dtype).itemsize
    align = 16 if isz < 4 else 8           # bf16 min tile is (16, 128)

    f_in_p = _round_up(f_in, 128)          # lane-dense MXU K dim
    hid_p = _round_up(hid, 128)
    out_p = _round_up(out_f, 128)          # lane-dense output -> unmasked stores

    # ---- adaptive node-block size (generation-aware) -------------------------
    vmem_cap = _vmem_capacity_bytes()
    data_budget = int(0.35 * vmem_cap)     # double-buffered data-tile target
    per_row_bytes = (2 * t * f_in_p * isz          # h_nbr (double-buffered)
                     + 2 * f_in_p * isz            # h_self
                     + 2 * 128 * 4                 # nbr weights (lane-padded)
                     + 2 * out_p * osz             # output
                     + (2 * hid_p + out_p) * 4)    # in-kernel f32 temporaries
    bn = max(align, data_budget // per_row_bytes)
    if block_nodes is not None:
        bn = min(bn, block_nodes)
    if n_nodes >= 2 * align:               # keep >= 2 grid steps (v7x: 2 TCs)
        bn = min(bn, _round_up(-(-n_nodes // 2), align))
    bn = min(bn, _round_up(n_nodes, align))
    bn = max(align, bn // align * align)
    n_pad = _round_up(n_nodes, bn)

    # ---- plain-JAX glue: gathers, normalization, padding, weight re-layout ---
    pad_n = n_pad - n_nodes
    nodeset_p = jnp.pad(nodeset, (0, pad_n))                    # pad with node 0
    nb_nodes_p = jnp.pad(nb_nodes, ((0, pad_n), (0, 0)))
    nbw = jnp.pad(nb_weights, ((0, pad_n), (0, 0))).astype(jnp.float32)

    # Pre-normalize neighbor weights (safediv) on the host: the kernel then
    # only does a plain weighted sum (no sublane reduce / approx reciprocal).
    den = jnp.sum(nbw, axis=1, keepdims=True)
    den = jnp.where(den == 0.0, 1.0, den)
    nbw_norm = nbw / den                                        # (Np, T) f32

    h_self = jnp.take(h, nodeset_p, axis=0)                     # (Np, F)
    # Neighbor-major gather: h_nbr[k, b] = h[nb_nodes[b, k]]  -> (T, Np, F)
    h_nbr = jnp.take(h, nb_nodes_p.T.reshape(-1), axis=0).reshape(t, n_pad, f_in)
    # TODO(synk): for large F_in (>=512 B/row), gather neighbor rows in-kernel
    # (scalar-prefetched nb_nodes + memory_space=pl.ANY h + manual
    # make_async_copy) to avoid this duplicated (T*Np, F_in) HBM round trip.

    h_self = jnp.pad(h_self, ((0, 0), (0, f_in_p - f_in))).astype(compute_dtype)
    h_nbr = jnp.pad(h_nbr, ((0, 0), (0, 0),
                            (0, f_in_p - f_in))).astype(compute_dtype)

    wq_t = jnp.pad(params["wq"].T,
                   ((0, f_in_p - f_in), (0, hid_p - hid))).astype(compute_dtype)
    bq = jnp.pad(params["bq"], (0, hid_p - hid)).reshape(1, hid_p).astype(jnp.float32)
    w1_t = jnp.pad(params["ww"][:, :f_in].T,
                   ((0, f_in_p - f_in), (0, out_p - out_f))).astype(compute_dtype)
    w2_t = jnp.pad(params["ww"][:, f_in:].T,
                   ((0, hid_p - hid), (0, out_p - out_f))).astype(compute_dtype)
    bw = jnp.pad(params["bw"], (0, out_p - out_f)).reshape(1, out_p).astype(jnp.float32)

    grid = (n_pad // bn,)

    # Grid-invariant operands: single-buffer so the saved VMEM goes back into
    # a bigger node block (biggest payoff on v7x's 64 MiB VMEM).
    def _const_spec(shape):
        return pl.BlockSpec(shape, lambda i: (0, 0), pipeline_mode=pl.Buffered(1))

    weight_bytes = ((f_in_p * hid_p + f_in_p * out_p + hid_p * out_p) * isz
                    + 8 * (hid_p + out_p) * 4)
    vmem_limit = int(min(int(0.8 * vmem_cap),
                         max(32 << 20,
                             bn * per_row_bytes + weight_bytes + (4 << 20))))

    flops = 2 * n_pad * (t * f_in_p * hid_p + f_in_p * out_p + hid_p * out_p)
    bytes_accessed = (h_self.size * isz + h_nbr.size * isz
                      + nbw_norm.size * 4
                      + (wq_t.size + w1_t.size + w2_t.size) * isz
                      + (bq.size + bw.size) * 4
                      + n_pad * out_p * osz)

    out = pl.pallas_call(
        _pinsage_kernel,
        out_shape=jax.ShapeDtypeStruct((n_pad, out_p), out_dtype),
        grid_spec=pltpu.PrefetchScalarGridSpec(
            num_scalar_prefetch=0,
            grid=grid,
            in_specs=[
                pl.BlockSpec((bn, f_in_p), lambda i: (i, 0)),      # h_self
                pl.BlockSpec((t, bn, f_in_p), lambda i: (0, i, 0)),  # h_nbr (T-major)
                pl.BlockSpec((bn, t), lambda i: (i, 0)),           # normalized weights
                _const_spec((f_in_p, hid_p)),                      # Q^T
                _const_spec((1, hid_p)),                           # Q bias
                _const_spec((f_in_p, out_p)),                      # W1^T
                _const_spec((hid_p, out_p)),                       # W2^T
                _const_spec((1, out_p)),                           # W bias
            ],
            out_specs=pl.BlockSpec((bn, out_p), lambda i: (i, 0)),
        ),
        compiler_params=pltpu.CompilerParams(
            dimension_semantics=("parallel",),   # v7x: shard steps across 2 TCs
            vmem_limit_bytes=vmem_limit),
        cost_estimate=pl.CostEstimate(
            flops=int(flops),
            transcendentals=int(n_pad),
            bytes_accessed=int(bytes_accessed)),
    )(h_self, h_nbr, nbw_norm, wq_t, bq, w1_t, w2_t, bw)

    return out[:n_nodes, :out_f]


def init_params(key, in_features, hidden_features, out_features):
    """Deterministic xavier_uniform init (gain = calculate_gain('leaky_relu'))."""
    gain = jnp.sqrt(2.0 / (1.0 + NEG_SLOPE ** 2))
    kq, kw = jax.random.split(key)

    def xavier(k, shape):
        fan_out, fan_in = shape
        bound = gain * jnp.sqrt(6.0 / (fan_in + fan_out))
        return jax.random.uniform(k, shape, jnp.float32, -bound, bound)

    return {
        "wq": xavier(kq, (hidden_features, in_features)),                 # Q.weight
        "bq": jnp.zeros((hidden_features,), jnp.float32),                 # Q.bias
        "ww": xavier(kw, (out_features, in_features + hidden_features)),  # W.weight
        "bw": jnp.zeros((out_features,), jnp.float32),                    # W.bias
    }


def pinsage_conv_ref(h, nodeset, nb_nodes, nb_weights, params):
    """Pure-JAX reference mirroring the PyTorch forward exactly."""
    n, t = nb_nodes.shape
    f_in = h.shape[1]
    h_self = h[nodeset]
    h_nbr = h[nb_nodes.reshape(-1)].reshape(n, t, f_in)
    hq = _leaky_relu(h_nbr @ params["wq"].T + params["bq"])
    den = nb_weights.sum(1, keepdims=True)
    den = jnp.where(den == 0, jnp.ones_like(den), den)
    h_agg = (nb_weights[:, :, None] * hq).sum(1) / den
    h_cat = jnp.concatenate([h_self, h_agg], axis=1)
    z = _leaky_relu(h_cat @ params["ww"].T + params["bw"])
    nrm = jnp.linalg.norm(z, axis=1, keepdims=True)
    nrm = jnp.where(nrm == 0, jnp.ones_like(nrm), nrm)
    return z / nrm


if __name__ == "__main__":
    # Small deterministic example.
    num_total_nodes = 64
    in_features = 32
    hidden_features = 32
    out_features = 32
    num_neighbors = 4

    key = jax.random.PRNGKey(0)
    k_h, k_ns, k_nb, k_w, k_p = jax.random.split(key, 5)

    h = jax.random.normal(k_h, (num_total_nodes, in_features), jnp.float32)
    params = init_params(k_p, in_features, hidden_features, out_features)

    # ---- test 1: tiny N (not a multiple of any block), f32 + bf16 paths -----
    num_nodes = 10
    nodeset = jax.random.randint(k_ns, (num_nodes,), 0, num_total_nodes, jnp.int32)
    nb_nodes = jax.random.randint(k_nb, (num_nodes, num_neighbors), 0,
                                  num_total_nodes, jnp.int32)
    nb_weights = jax.random.uniform(k_w, (num_nodes, num_neighbors), jnp.float32)
    # Zero out one row of weights to exercise the safediv path.
    nb_weights = nb_weights.at[1].set(0.0)

    ref = pinsage_conv_ref(h, nodeset, nb_nodes, nb_weights, params)

    out_f32 = jax.block_until_ready(
        pinsage_conv(h, nodeset, nb_nodes, nb_weights, params,
                     compute_dtype=jnp.float32))
    assert out_f32.shape == (num_nodes, out_features)
    assert jnp.allclose(out_f32, ref, atol=5e-3, rtol=5e-3), "f32 mismatch vs reference"

    out_bf16 = jax.block_until_ready(
        pinsage_conv(h, nodeset, nb_nodes, nb_weights, params))
    assert out_bf16.shape == (num_nodes, out_features)
    assert jnp.allclose(out_bf16.astype(jnp.float32), ref,
                        atol=5e-2, rtol=5e-2), "bf16 mismatch vs reference"

    # ---- test 2: multi-block grid (>1 step) + tail padding -------------------
    num_nodes2 = 200
    nodeset2 = jax.random.randint(k_ns, (num_nodes2,), 0, num_total_nodes, jnp.int32)
    nb_nodes2 = jax.random.randint(k_nb, (num_nodes2, num_neighbors), 0,
                                   num_total_nodes, jnp.int32)
    nb_weights2 = jax.random.uniform(k_w, (num_nodes2, num_neighbors), jnp.float32)

    ref2 = pinsage_conv_ref(h, nodeset2, nb_nodes2, nb_weights2, params)
    out2 = jax.block_until_ready(
        pinsage_conv(h, nodeset2, nb_nodes2, nb_weights2, params,
                     block_nodes=64, compute_dtype=jnp.float32))
    assert out2.shape == (num_nodes2, out_features)
    assert jnp.allclose(out2, ref2, atol=5e-3, rtol=5e-3), "multi-block mismatch"

    print("KERNEL_OK")
</pallas_src>

<mosaic_0001>
module attributes {stable_mosaic.version = 11 : i64} {
  func.func @_pinsage_kernel(%arg0: i32, %arg1: memref<16x128xf32, #tpu.memory_space<vmem>>, %arg2: memref<4x16x128xf32, #tpu.memory_space<vmem>>, %arg3: memref<16x4xf32, #tpu.memory_space<vmem>>, %arg4: memref<128x128xf32, #tpu.memory_space<vmem>>, %arg5: memref<1x128xf32, #tpu.memory_space<vmem>>, %arg6: memref<128x128xf32, #tpu.memory_space<vmem>>, %arg7: memref<128x128xf32, #tpu.memory_space<vmem>>, %arg8: memref<1x128xf32, #tpu.memory_space<vmem>>, %arg9: memref<16x128xf32, #tpu.memory_space<vmem>>) attributes {dimension_semantics = [#tpu.dimension_semantics<parallel>], iteration_bounds = array<i64: 1>, scalar_prefetch = 0 : i64, scratch_operands = 0 : i64, tpu.core_type = #tpu.core_type<tc>, window_params = [{transform_indices = @transform_0, window_bounds = array<i64: 16, 128>}, {transform_indices = @transform_1, window_bounds = array<i64: 4, 16, 128>}, {transform_indices = @transform_2, window_bounds = array<i64: 16, 4>}, {pipeline_mode = #tpu.pipeline_mode<synchronous>, transform_indices = @transform_3, window_bounds = array<i64: 128, 128>}, {pipeline_mode = #tpu.pipeline_mode<synchronous>, transform_indices = @transform_4, window_bounds = array<i64: 1, 128>}, {pipeline_mode = #tpu.pipeline_mode<synchronous>, transform_indices = @transform_5, window_bounds = array<i64: 128, 128>}, {pipeline_mode = #tpu.pipeline_mode<synchronous>, transform_indices = @transform_6, window_bounds = array<i64: 128, 128>}, {pipeline_mode = #tpu.pipeline_mode<synchronous>, transform_indices = @transform_7, window_bounds = array<i64: 1, 128>}, {transform_indices = @transform_8, window_bounds = array<i64: 16, 128>}]} {
    %c0 = arith.constant 0 : index
    %c0_0 = arith.constant 0 : index
    %0 = vector.load %arg4[%c0, %c0_0] : memref<128x128xf32, #tpu.memory_space<vmem>>, vector<128x128xf32>
    %c0_1 = arith.constant 0 : index
    %c0_2 = arith.constant 0 : index
    %1 = vector.load %arg5[%c0_1, %c0_2] : memref<1x128xf32, #tpu.memory_space<vmem>>, vector<1x128xf32>
    %c0_3 = arith.constant 0 : index
    %c0_4 = arith.constant 0 : index
    %2 = vector.load %arg3[%c0_3, %c0_4] : memref<16x4xf32, #tpu.memory_space<vmem>>, vector<16x4xf32>
    %cst = arith.constant 0.000000e+00 : f32
    %3 = vector.broadcast %cst : f32 to vector<16x128xf32>
    %c0_5 = arith.constant 0 : index
    %c0_6 = arith.constant 0 : index
    %c0_7 = arith.constant 0 : index
    %4 = vector.load %arg2[%c0_5, %c0_6, %c0_7] : memref<4x16x128xf32, #tpu.memory_space<vmem>>, vector<1x16x128xf32>
    %5 = vector.shape_cast %4 : vector<1x16x128xf32> to vector<16x128xf32>
    %cst_8 = arith.constant dense<0.000000e+00> : vector<16x128xf32>
    %6 = tpu.matmul %5, %0, %cst_8 {dimension_numbers = #tpu.dot_dimension_numbers<[1], [0], [0], [1], [0, 0, 1, 1], [], []>} : vector<16x128xf32>, vector<128x128xf32>, vector<16x128xf32> -> vector<16x128xf32>
    %7 = vector.broadcast %1 : vector<1x128xf32> to vector<16x128xf32>
    %8 = arith.addf %6, %7 : vector<16x128xf32>
    %cst_9 = arith.constant 0.000000e+00 : f32
    %9 = vector.broadcast %cst_9 : f32 to vector<16x128xf32>
    %10 = arith.cmpf oge, %8, %9 : vector<16x128xf32>
    %cst_10 = arith.constant 0.00999999977 : f32
    %11 = vector.broadcast %cst_10 : f32 to vector<16x128xf32>
    %12 = arith.mulf %11, %8 : vector<16x128xf32>
    %13 = arith.select %10, %8, %12 : vector<16x128xi1>, vector<16x128xf32>
    %14 = vector.extract_strided_slice %2 {offsets = [0, 0], sizes = [16, 1], strides = [1, 1]} : vector<16x4xf32> to vector<16x1xf32>
    %15 = vector.broadcast %14 : vector<16x1xf32> to vector<16x128xf32>
    %16 = arith.mulf %15, %13 : vector<16x128xf32>
    %17 = arith.addf %3, %16 : vector<16x128xf32>
    %c1 = arith.constant 1 : index
    %c0_11 = arith.constant 0 : index
    %c0_12 = arith.constant 0 : index
    %18 = vector.load %arg2[%c1, %c0_11, %c0_12] : memref<4x16x128xf32, #tpu.memory_space<vmem>>, vector<1x16x128xf32>
    %19 = vector.shape_cast %18 : vector<1x16x128xf32> to vector<16x128xf32>
    %cst_13 = arith.constant dense<0.000000e+00> : vector<16x128xf32>
    %20 = tpu.matmul %19, %0, %cst_13 {dimension_numbers = #tpu.dot_dimension_numbers<[1], [0], [0], [1], [0, 0, 1, 1], [], []>} : vector<16x128xf32>, vector<128x128xf32>, vector<16x128xf32> -> vector<16x128xf32>
    %21 = vector.broadcast %1 : vector<1x128xf32> to vector<16x128xf32>
    %22 = arith.addf %20, %21 : vector<16x128xf32>
    %cst_14 = arith.constant 0.000000e+00 : f32
    %23 = vector.broadcast %cst_14 : f32 to vector<16x128xf32>
    %24 = arith.cmpf oge, %22, %23 : vector<16x128xf32>
    %cst_15 = arith.constant 0.00999999977 : f32
    %25 = vector.broadcast %cst_15 : f32 to vector<16x128xf32>
    %26 = arith.mulf %25, %22 : vector<16x128xf32>
    %27 = arith.select %24, %22, %26 : vector<16x128xi1>, vector<16x128xf32>
    %28 = vector.extract_strided_slice %2 {offsets = [0, 1], sizes = [16, 1], strides = [1, 1]} : vector<16x4xf32> to vector<16x1xf32>
    %29 = vector.broadcast %28 : vector<16x1xf32> to vector<16x128xf32>
    %30 = arith.mulf %29, %27 : vector<16x128xf32>
    %31 = arith.addf %17, %30 : vector<16x128xf32>
    %c2 = arith.constant 2 : index
    %c0_16 = arith.constant 0 : index
    %c0_17 = arith.constant 0 : index
    %32 = vector.load %arg2[%c2, %c0_16, %c0_17] : memref<4x16x128xf32, #tpu.memory_space<vmem>>, vector<1x16x128xf32>
    %33 = vector.shape_cast %32 : vector<1x16x128xf32> to vector<16x128xf32>
    %cst_18 = arith.constant dense<0.000000e+00> : vector<16x128xf32>
    %34 = tpu.matmul %33, %0, %cst_18 {dimension_numbers = #tpu.dot_dimension_numbers<[1], [0], [0], [1], [0, 0, 1, 1], [], []>} : vector<16x128xf32>, vector<128x128xf32>, vector<16x128xf32> -> vector<16x128xf32>
    %35 = vector.broadcast %1 : vector<1x128xf32> to vector<16x128xf32>
    %36 = arith.addf %34, %35 : vector<16x128xf32>
    %cst_19 = arith.constant 0.000000e+00 : f32
    %37 = vector.broadcast %cst_19 : f32 to vector<16x128xf32>
    %38 = arith.cmpf oge, %36, %37 : vector<16x128xf32>
    %cst_20 = arith.constant 0.00999999977 : f32
    %39 = vector.broadcast %cst_20 : f32 to vector<16x128xf32>
    %40 = arith.mulf %39, %36 : vector<16x128xf32>
    %41 = arith.select %38, %36, %40 : vector<16x128xi1>, vector<16x128xf32>
    %42 = vector.extract_strided_slice %2 {offsets = [0, 2], sizes = [16, 1], strides = [1, 1]} : vector<16x4xf32> to vector<16x1xf32>
    %43 = vector.broadcast %42 : vector<16x1xf32> to vector<16x128xf32>
    %44 = arith.mulf %43, %41 : vector<16x128xf32>
    %45 = arith.addf %31, %44 : vector<16x128xf32>
    %c3 = arith.constant 3 : index
    %c0_21 = arith.constant 0 : index
    %c0_22 = arith.constant 0 : index
    %46 = vector.load %arg2[%c3, %c0_21, %c0_22] : memref<4x16x128xf32, #tpu.memory_space<vmem>>, vector<1x16x128xf32>
    %47 = vector.shape_cast %46 : vector<1x16x128xf32> to vector<16x128xf32>
    %cst_23 = arith.constant dense<0.000000e+00> : vector<16x128xf32>
    %48 = tpu.matmul %47, %0, %cst_23 {dimension_numbers = #tpu.dot_dimension_numbers<[1], [0], [0], [1], [0, 0, 1, 1], [], []>} : vector<16x128xf32>, vector<128x128xf32>, vector<16x128xf32> -> vector<16x128xf32>
    %49 = vector.broadcast %1 : vector<1x128xf32> to vector<16x128xf32>
    %50 = arith.addf %48, %49 : vector<16x128xf32>
    %cst_24 = arith.constant 0.000000e+00 : f32
    %51 = vector.broadcast %cst_24 : f32 to vector<16x128xf32>
    %52 = arith.cmpf oge, %50, %51 : vector<16x128xf32>
    %cst_25 = arith.constant 0.00999999977 : f32
    %53 = vector.broadcast %cst_25 : f32 to vector<16x128xf32>
    %54 = arith.mulf %53, %50 : vector<16x128xf32>
    %55 = arith.select %52, %50, %54 : vector<16x128xi1>, vector<16x128xf32>
    %56 = vector.extract_strided_slice %2 {offsets = [0, 3], sizes = [16, 1], strides = [1, 1]} : vector<16x4xf32> to vector<16x1xf32>
    %57 = vector.broadcast %56 : vector<16x1xf32> to vector<16x128xf32>
    %58 = arith.mulf %57, %55 : vector<16x128xf32>
    %59 = arith.addf %45, %58 : vector<16x128xf32>
    %c0_26 = arith.constant 0 : index
    %c0_27 = arith.constant 0 : index
    %60 = vector.load %arg1[%c0_26, %c0_27] : memref<16x128xf32, #tpu.memory_space<vmem>>, vector<16x128xf32>
    %c0_28 = arith.constant 0 : index
    %c0_29 = arith.constant 0 : index
    %61 = vector.load %arg6[%c0_28, %c0_29] : memref<128x128xf32, #tpu.memory_space<vmem>>, vector<128x128xf32>
    %cst_30 = arith.constant dense<0.000000e+00> : vector<16x128xf32>
    %62 = tpu.matmul %60, %61, %cst_30 {dimension_numbers = #tpu.dot_dimension_numbers<[1], [0], [0], [1], [0, 0, 1, 1], [], []>} : vector<16x128xf32>, vector<128x128xf32>, vector<16x128xf32> -> vector<16x128xf32>
    %c0_31 = arith.constant 0 : index
    %c0_32 = arith.constant 0 : index
    %63 = vector.load %arg7[%c0_31, %c0_32] : memref<128x128xf32, #tpu.memory_space<vmem>>, vector<128x128xf32>
    %cst_33 = arith.constant dense<0.000000e+00> : vector<16x128xf32>
    %64 = tpu.matmul %59, %63, %cst_33 {dimension_numbers = #tpu.dot_dimension_numbers<[1], [0], [0], [1], [0, 0, 1, 1], [], []>} : vector<16x128xf32>, vector<128x128xf32>, vector<16x128xf32> -> vector<16x128xf32>
    %65 = arith.addf %62, %64 : vector<16x128xf32>
    %c0_34 = arith.constant 0 : index
    %c0_35 = arith.constant 0 : index
    %66 = vector.load %arg8[%c0_34, %c0_35] : memref<1x128xf32, #tpu.memory_space<vmem>>, vector<1x128xf32>
    %67 = vector.broadcast %66 : vector<1x128xf32> to vector<16x128xf32>
    %68 = arith.addf %65, %67 : vector<16x128xf32>
    %cst_36 = arith.constant 0.000000e+00 : f32
    %69 = vector.broadcast %cst_36 : f32 to vector<16x128xf32>
    %70 = arith.cmpf oge, %68, %69 : vector<16x128xf32>
    %cst_37 = arith.constant 0.00999999977 : f32
    %71 = vector.broadcast %cst_37 : f32 to vector<16x128xf32>
    %72 = arith.mulf %71, %68 : vector<16x128xf32>
    %73 = arith.select %70, %68, %72 : vector<16x128xi1>, vector<16x128xf32>
    %74 = arith.mulf %73, %73 : vector<16x128xf32>
    %cst_38 = arith.constant dense<0.000000e+00> : vector<16xf32>
    %75 = vector.multi_reduction <add>, %74, %cst_38 [1] : vector<16x128xf32> to vector<16xf32>
    %76 = vector.shape_cast %75 : vector<16xf32> to vector<16x1xf32>
    %cst_39 = arith.constant 0.000000e+00 : f32
    %77 = vector.broadcast %cst_39 : f32 to vector<16x1xf32>
    %78 = arith.cmpf oeq, %76, %77 : vector<16x1xf32>
    %cst_40 = arith.constant 1.000000e+00 : f32
    %79 = vector.broadcast %cst_40 : f32 to vector<16x1xf32>
    %80 = arith.select %78, %79, %76 : vector<16x1xi1>, vector<16x1xf32>
    %81 = math.rsqrt %80 : vector<16x1xf32>
    %82 = vector.broadcast %81 : vector<16x1xf32> to vector<16x128xf32>
    %83 = arith.mulf %73, %82 : vector<16x128xf32>
    %c0_41 = arith.constant 0 : index
    %c0_42 = arith.constant 0 : index
    %84 = vector.load %arg9[%c0_41, %c0_42] : memref<16x128xf32, #tpu.memory_space<vmem>>, vector<16x128xf32>
    tpu.vector_store %arg9[%c0_41, %c0_42], %83 {strides = array<i32>} : memref<16x128xf32, #tpu.memory_space<vmem>>, vector<16x128xf32>,
    return
  }
  func.func @transform_0(%arg0: i32) -> (i32, i32) {
    %c0_i32 = arith.constant 0 : i32
    %c0_i32_0 = arith.constant 0 : i32
    return %arg0, %c0_i32 : i32, i32
  }
  func.func @transform_1(%arg0: i32) -> (i32, i32, i32) {
    %c0_i32 = arith.constant 0 : i32
    %c0_i32_0 = arith.constant 0 : i32
    %c0_i32_1 = arith.constant 0 : i32
    return %c0_i32, %arg0, %c0_i32_0 : i32, i32, i32
  }
  func.func @transform_2(%arg0: i32) -> (i32, i32) {
    %c0_i32 = arith.constant 0 : i32
    %c0_i32_0 = arith.constant 0 : i32
    return %arg0, %c0_i32 : i32, i32
  }
  func.func @transform_3(%arg0: i32) -> (i32, i32) {
    %c0_i32 = arith.constant 0 : i32
    %c0_i32_0 = arith.constant 0 : i32
    %c0_i32_1 = arith.constant 0 : i32
    return %c0_i32, %c0_i32_0 : i32, i32
  }
  func.func @transform_4(%arg0: i32) -> (i32, i32) {
    %c0_i32 = arith.constant 0 : i32
    %c0_i32_0 = arith.constant 0 : i32
    %c0_i32_1 = arith.constant 0 : i32
    return %c0_i32, %c0_i32_0 : i32, i32
  }
  func.func @transform_5(%arg0: i32) -> (i32, i32) {
    %c0_i32 = arith.constant 0 : i32
    %c0_i32_0 = arith.constant 0 : i32
    %c0_i32_1 = arith.constant 0 : i32
    return %c0_i32, %c0_i32_0 : i32, i32
  }
  func.func @transform_6(%arg0: i32) -> (i32, i32) {
    %c0_i32 = arith.constant 0 : i32
    %c0_i32_0 = arith.constant 0 : i32
    %c0_i32_1 = arith.constant 0 : i32
    return %c0_i32, %c0_i32_0 : i32, i32
  }
  func.func @transform_7(%arg0: i32) -> (i32, i32) {
    %c0_i32 = arith.constant 0 : i32
    %c0_i32_0 = arith.constant 0 : i32
    %c0_i32_1 = arith.constant 0 : i32
    return %c0_i32, %c0_i32_0 : i32, i32
  }
  func.func @transform_8(%arg0: i32) -> (i32, i32) {
    %c0_i32 = arith.constant 0 : i32
    %c0_i32_0 = arith.constant 0 : i32
    return %arg0, %c0_i32 : i32, i32
  }
}

</mosaic_0001>

<bundles_post_ra>
// kernel: pinsage_conv.1
= control target key start
LH: loop header
LB: loop body
LE: loop exit
PB: predicated region body
PF: predicated region fallthrough
CT: control target
= control target key end

     0   :  { %s1439_s0 = inlined_call_operand.vmem [shape: f32[16,128], index: 0, kind: input, shape index: {}]   ;;  %s1440_s1 = inlined_call_operand.vmem [shape: f32[4,16,128], index: 1, kind: input, shape index: {}]   ;;  %s1441_s2 = inlined_call_operand.vmem [shape: f32[16,4], index: 2, kind: input, shape index: {}]   ;;  %s1442_s3 = inlined_call_operand.vmem [shape: f32[128,128], index: 3, kind: input, shape index: {}]   ;;  %s1443_s4 = inlined_call_operand.vmem [shape: f32[1,128], index: 4, kind: input, shape index: {}]   ;;  %s1444_s5 = inlined_call_operand.vmem [shape: f32[128,128], index: 5, kind: input, shape index: {}]   ;;  %s1445_s6 = inlined_call_operand.vmem [shape: f32[128,128], index: 6, kind: input, shape index: {}]   ;;  %s1446_s7 = inlined_call_operand.vmem [shape: f32[1,128], index: 7, kind: input, shape index: {}]   ;;  %s1447_s8 = inlined_call_operand.hbm [shape: f32[16,128], index: 8, kind: output, shape index: {}]  }
   0x1   :  { %v1093_v0 = vld [vmem:[%s1442_s3 + $0x78] sm:$0xff]  ;;  %v1098_v1 = vld [vmem:[%s1442_s3 + $0x70] sm:$0xff]  ;;  %v1107_v2 = vld [vmem:[%s1442_s3 + $0x68] sm:$0xff] }
   0x2   :  { %787 = vmatprep.subr.mxu0 %v1093_v0  ;;  %822 = vmatprep.subr.mxu1 %v1093_v0  ;;  %v1116_v3 = vld [vmem:[%s1442_s3 + $0x60] sm:$0xff]  ;;  %v1125_v4 = vld [vmem:[%s1442_s3 + $0x58] sm:$0xff]  ;;  %v1134_v5 = vld [vmem:[%s1442_s3 + $0x50] sm:$0xff] }
   0x3   :  { %788 = vmatpush3.msra.mxu0 %v1093_v0  ;;  %823 = vmatpush3.msra.mxu1 %v1093_v0 }
   0x4   :  { %789 = vmatprep.subr.mxu0 %v1098_v1  ;;  %824 = vmatprep.subr.mxu1 %v1098_v1 }
   0x5   :  { %790 = vmatpush3.msra.mxu0 %v1098_v1  ;;  %825 = vmatpush3.msra.mxu1 %v1098_v1 }
   0x6   :  { %791 = vmatprep.subr.mxu0 %v1107_v2  ;;  %826 = vmatprep.subr.mxu1 %v1107_v2 }
   0x7   :  { %792 = vmatpush3.msra.mxu0 %v1107_v2  ;;  %827 = vmatpush3.msra.mxu1 %v1107_v2 }
   0x8   :  { %793 = vmatprep.subr.mxu0 %v1116_v3  ;;  %828 = vmatprep.subr.mxu1 %v1116_v3 }
   0x9   :  { %794 = vmatpush3.msra.mxu0 %v1116_v3  ;;  %829 = vmatpush3.msra.mxu1 %v1116_v3 }
   0xa   :  { %13 = vsyncpa [#allocation3], 0  ;;  %795 = vmatprep.subr.mxu0 %v1125_v4  ;;  %830 = vmatprep.subr.mxu1 %v1125_v4  ;;  %v1143_v6 = vld [vmem:[%s1442_s3 + $0x48] sm:$0xff]  ;;  %v1152_v7 = vld [vmem:[%s1442_s3 + $0x40] sm:$0xff]  ;;  %v1038_v26 = vmov 0   ;;  %v1039_v27 = vmov 1  }
   0xb   :  { %796 = vmatpush3.msra.mxu0 %v1125_v4  ;;  %831 = vmatpush3.msra.mxu1 %v1125_v4  ;;  %v1161_v8 = vld [vmem:[%s1442_s3 + $0x38] sm:$0xff]  ;;  %v1170_v9 = vld [vmem:[%s1442_s3 + $0x30] sm:$0xff]  ;;  %v1179_v10 = vld [vmem:[%s1442_s3 + $0x28] sm:$0xff]  ;;  %v1040_v28 = vmov 2   ;;  %v1041_v29 = vmov 3  }
   0xc   :  { %797 = vmatprep.subr.mxu0 %v1134_v5  ;;  %832 = vmatprep.subr.mxu1 %v1134_v5  ;;  %v1188_v11 = vld [vmem:[%s1442_s3 + $0x20] sm:$0xff]  ;;  %v1197_v12 = vld [vmem:[%s1442_s3 + $0x18] sm:$0xff]  ;;  %v1206_v13 = vld [vmem:[%s1442_s3 + $0x10] sm:$0xff] }
   0xd   :  { %798 = vmatpush3.msra.mxu0 %v1134_v5  ;;  %833 = vmatpush3.msra.mxu1 %v1134_v5  ;;  %v1215_v14 = vld [vmem:[%s1442_s3 + $0x8] sm:$0xff]  ;;  %v1224_v15 = vld [vmem:[%s1442_s3] sm:$0xff]  ;;  %v672_v17 = vld [vmem:[%s1440_s1 + $0x10] sm:$0xff] }
   0xe   :  { %799 = vmatprep.subr.mxu0 %v1143_v6  ;;  %834 = vmatprep.subr.mxu1 %v1143_v6  ;;  %v49_v16 = vld [vmem:[%s1440_s1] sm:$0xff]  ;;  %v50_v18 = vld [vmem:[%s1440_s1 + $0x8] sm:$0xff]  ;;  %v673_v19 = vld [vmem:[%s1440_s1 + $0x18] sm:$0xff] }
   0xf   :  { %800 = vmatpush3.msra.mxu0 %v1143_v6  ;;  %835 = vmatpush3.msra.mxu1 %v1143_v6  ;;  %v674_v20 = vld [vmem:[%s1440_s1 + $0x20] sm:$0xff]  ;;  %v676_v21 = vld [vmem:[%s1440_s1 + $0x30] sm:$0xff]  ;;  %v675_v22 = vld [vmem:[%s1440_s1 + $0x28] sm:$0xff] }
  0x10   :  { %801 = vmatprep.subr.mxu0 %v1152_v7  ;;  %836 = vmatprep.subr.mxu1 %v1152_v7  ;;  %v677_v23 = vld [vmem:[%s1440_s1 + $0x38] sm:$0xff]  ;;  %v48_v24 = vld [vmem:[%s1441_s2 + $0x8] sm:$0xff]  ;;  %v47_v25 = vld [vmem:[%s1441_s2] sm:$0xff] }
  0x11   :  { %802 = vmatpush3.msra.mxu0 %v1152_v7  ;;  %837 = vmatpush3.msra.mxu1 %v1152_v7  ;;  %v457_v30 = vld [vmem:[%s1444_s5 + $0x78] sm:$0xff]  ;;  %v456_v32 = vld [vmem:[%s1444_s5 + $0x70] sm:$0xff]  ;;  %v455_v34 = vld [vmem:[%s1444_s5 + $0x68] sm:$0xff] }
  0x12   :  { %803 = vmatprep.subr.mxu0 %v1161_v8  ;;  %838 = vmatprep.subr.mxu1 %v1161_v8  ;;  %v473_v31 = vld [vmem:[%s1445_s6 + $0x78] sm:$0xff]  ;;  %v472_v33 = vld [vmem:[%s1445_s6 + $0x70] sm:$0xff]  ;;  %v471_v35 = vld [vmem:[%s1445_s6 + $0x68] sm:$0xff] }
  0x13   :  { %804 = vmatpush3.msra.mxu0 %v1161_v8  ;;  %839 = vmatpush3.msra.mxu1 %v1161_v8  ;;  %v454_v36 = vld [vmem:[%s1444_s5 + $0x60] sm:$0xff]  ;;  %v453_v38 = vld [vmem:[%s1444_s5 + $0x58] sm:$0xff]  ;;  %v452_v40 = vld [vmem:[%s1444_s5 + $0x50] sm:$0xff] }
  0x14   :  { %805 = vmatprep.subr.mxu0 %v1170_v9  ;;  %840 = vmatprep.subr.mxu1 %v1170_v9  ;;  %v470_v37 = vld [vmem:[%s1445_s6 + $0x60] sm:$0xff]  ;;  %v469_v39 = vld [vmem:[%s1445_s6 + $0x58] sm:$0xff]  ;;  %v468_v41 = vld [vmem:[%s1445_s6 + $0x50] sm:$0xff] }
  0x15   :  { %806 = vmatpush3.msra.mxu0 %v1170_v9  ;;  %841 = vmatpush3.msra.mxu1 %v1170_v9  ;;  %v451_v42 = vld [vmem:[%s1444_s5 + $0x48] sm:$0xff]  ;;  %v450_v44 = vld [vmem:[%s1444_s5 + $0x40] sm:$0xff]  ;;  %v449_v46 = vld [vmem:[%s1444_s5 + $0x38] sm:$0xff] }
  0x16   :  { %807 = vmatprep.subr.mxu0 %v1179_v10  ;;  %842 = vmatprep.subr.mxu1 %v1179_v10  ;;  %v467_v43 = vld [vmem:[%s1445_s6 + $0x48] sm:$0xff]  ;;  %v466_v45 = vld [vmem:[%s1445_s6 + $0x40] sm:$0xff]  ;;  %v465_v47 = vld [vmem:[%s1445_s6 + $0x38] sm:$0xff] }
  0x17   :  { %808 = vmatpush3.msra.mxu0 %v1179_v10  ;;  %843 = vmatpush3.msra.mxu1 %v1179_v10  ;;  %v448_v48 = vld [vmem:[%s1444_s5 + $0x30] sm:$0xff]  ;;  %v447_v50 = vld [vmem:[%s1444_s5 + $0x28] sm:$0xff]  ;;  %v446_v52 = vld [vmem:[%s1444_s5 + $0x20] sm:$0xff] }
  0x18   :  { %809 = vmatprep.subr.mxu0 %v1188_v11  ;;  %844 = vmatprep.subr.mxu1 %v1188_v11  ;;  %v464_v49 = vld [vmem:[%s1445_s6 + $0x30] sm:$0xff]  ;;  %v463_v51 = vld [vmem:[%s1445_s6 + $0x28] sm:$0xff]  ;;  %v462_v53 = vld [vmem:[%s1445_s6 + $0x20] sm:$0xff] }
  0x19   :  { %810 = vmatpush3.msra.mxu0 %v1188_v11  ;;  %845 = vmatpush3.msra.mxu1 %v1188_v11  ;;  %v445_v54 = vld [vmem:[%s1444_s5 + $0x18] sm:$0xff]  ;;  %v444_v56 = vld [vmem:[%s1444_s5 + $0x10] sm:$0xff]  ;;  %v443_v58 = vld [vmem:[%s1444_s5 + $0x8] sm:$0xff] }
  0x1a   :  { %811 = vmatprep.subr.mxu0 %v1197_v12  ;;  %846 = vmatprep.subr.mxu1 %v1197_v12  ;;  %v461_v55 = vld [vmem:[%s1445_s6 + $0x18] sm:$0xff]  ;;  %v460_v57 = vld [vmem:[%s1445_s6 + $0x10] sm:$0xff]  ;;  %v459_v59 = vld [vmem:[%s1445_s6 + $0x8] sm:$0xff] }
  0x1b   :  { %812 = vmatpush3.msra.mxu0 %v1197_v12  ;;  %847 = vmatpush3.msra.mxu1 %v1197_v12  ;;  %v442_v60 = vld [vmem:[%s1444_s5] sm:$0xff]  ;;  %v441_v63 = vld [vmem:[%s1439_s0 + $0x8] sm:$0xff] }
  0x1c   :  { %813 = vmatprep.subr.mxu0 %v1206_v13  ;;  %848 = vmatprep.subr.mxu1 %v1206_v13  ;;  %v440_v61 = vld [vmem:[%s1439_s0] sm:$0xff] }
  0x1d   :  { %814 = vmatpush3.msra.mxu0 %v1206_v13  ;;  %849 = vmatpush3.msra.mxu1 %v1206_v13  ;;  %v458_v62 = vld [vmem:[%s1445_s6] sm:$0xff]  ;;  %s1042_s6 = smov [#allocation2]  }
  0x1e   :  { %815 = vmatprep.subr.mxu0 %v1215_v14  ;;  %850 = vmatprep.subr.mxu1 %v1215_v14 }
  0x1f   :  { %816 = vmatpush3.msra.mxu0 %v1215_v14  ;;  %851 = vmatpush3.msra.mxu1 %v1215_v14 }
  0x20   :  { %817 = vmatprep.subr.mxu0 %v1224_v15  ;;  %852 = vmatprep.subr.mxu1 %v1224_v15 }
  0x21   :  { %818 = vmatpush3.msra.mxu0 %v1224_v15  ;;  %819 = vmatprep.mubr.f32.mxu0 %v49_v16 }
  0x22   :  { %853 = vmatpush3.msra.mxu1 %v1224_v15  ;;  %854 = vmatprep.mubr.f32.mxu1 %v672_v17 }
  0x23   :  { %820 = vmatmul.mubr.f32.vlgmr.msra.gmra.mxu0 %v50_v18  ;;  %855 = vmatmul.mubr.f32.vlgmr.msra.gmra.mxu1 %v673_v19 }
  0x24   :  { %857 = vmatprep.subr.mxu0 %v1093_v0  ;;  %892 = vmatprep.subr.mxu1 %v1093_v0 }
  0x25   :  { %858 = vmatpush3.msra.mxu0 %v1093_v0  ;;  %893 = vmatpush3.msra.mxu1 %v1093_v0 }
  0x26   :  { %859 = vmatprep.subr.mxu0 %v1098_v1  ;;  %894 = vmatprep.subr.mxu1 %v1098_v1 }
  0x27   :  { %860 = vmatpush3.msra.mxu0 %v1098_v1  ;;  %895 = vmatpush3.msra.mxu1 %v1098_v1 }
  0x28   :  { %861 = vmatprep.subr.mxu0 %v1107_v2  ;;  %896 = vmatprep.subr.mxu1 %v1107_v2 }
  0x29   :  { %862 = vmatpush3.msra.mxu0 %v1107_v2  ;;  %897 = vmatpush3.msra.mxu1 %v1107_v2 }
  0x2a   :  { %863 = vmatprep.subr.mxu0 %v1116_v3  ;;  %898 = vmatprep.subr.mxu1 %v1116_v3 }
  0x2b   :  { %864 = vmatpush3.msra.mxu0 %v1116_v3  ;;  %899 = vmatpush3.msra.mxu1 %v1116_v3  ;;  %v671_v3 = vld [vmem:[%s1443_s4] ss:$0 sm:$0xff] }
  0x2c   :  { %865 = vmatprep.subr.mxu0 %v1125_v4  ;;  %900 = vmatprep.subr.mxu1 %v1125_v4 }
  0x2d   :  { %866 = vmatpush3.msra.mxu0 %v1125_v4  ;;  %901 = vmatpush3.msra.mxu1 %v1125_v4 }
  0x2e   :  { %867 = vmatprep.subr.mxu0 %v1134_v5  ;;  %902 = vmatprep.subr.mxu1 %v1134_v5 }
  0x2f   :  { %868 = vmatpush3.msra.mxu0 %v1134_v5  ;;  %903 = vmatpush3.msra.mxu1 %v1134_v5 }
  0x30   :  { %869 = vmatprep.subr.mxu0 %v1143_v6  ;;  %904 = vmatprep.subr.mxu1 %v1143_v6 }
  0x31   :  { %870 = vmatpush3.msra.mxu0 %v1143_v6  ;;  %905 = vmatpush3.msra.mxu1 %v1143_v6 }
  0x32   :  { %871 = vmatprep.subr.mxu0 %v1152_v7  ;;  %906 = vmatprep.subr.mxu1 %v1152_v7 }
  0x33   :  { %872 = vmatpush3.msra.mxu0 %v1152_v7  ;;  %907 = vmatpush3.msra.mxu1 %v1152_v7 }
  0x34   :  { %873 = vmatprep.subr.mxu0 %v1161_v8  ;;  %908 = vmatprep.subr.mxu1 %v1161_v8 }
  0x35   :  { %874 = vmatpush3.msra.mxu0 %v1161_v8  ;;  %909 = vmatpush3.msra.mxu1 %v1161_v8 }
  0x36   :  { %875 = vmatprep.subr.mxu0 %v1170_v9  ;;  %910 = vmatprep.subr.mxu1 %v1170_v9 }
  0x37   :  { %876 = vmatpush3.msra.mxu0 %v1170_v9  ;;  %911 = vmatpush3.msra.mxu1 %v1170_v9 }
  0x38   :  { %877 = vmatprep.subr.mxu0 %v1179_v10  ;;  %912 = vmatprep.subr.mxu1 %v1179_v10 }
  0x39   :  { %878 = vmatpush3.msra.mxu0 %v1179_v10  ;;  %913 = vmatpush3.msra.mxu1 %v1179_v10 }
  0x3a   :  { %879 = vmatprep.subr.mxu0 %v1188_v11  ;;  %914 = vmatprep.subr.mxu1 %v1188_v11 }
  0x3b   :  { %880 = vmatpush3.msra.mxu0 %v1188_v11  ;;  %915 = vmatpush3.msra.mxu1 %v1188_v11 }
  0x3c   :  { %881 = vmatprep.subr.mxu0 %v1197_v12  ;;  %916 = vmatprep.subr.mxu1 %v1197_v12 }
  0x3d   :  { %882 = vmatpush3.msra.mxu0 %v1197_v12  ;;  %917 = vmatpush3.msra.mxu1 %v1197_v12 }
  0x3e   :  { %883 = vmatprep.subr.mxu0 %v1206_v13  ;;  %918 = vmatprep.subr.mxu1 %v1206_v13 }
  0x3f   :  { %884 = vmatpush3.msra.mxu0 %v1206_v13  ;;  %919 = vmatpush3.msra.mxu1 %v1206_v13 }
  0x40   :  { %885 = vmatprep.subr.mxu0 %v1215_v14  ;;  %920 = vmatprep.subr.mxu1 %v1215_v14 }
  0x41   :  { %886 = vmatpush3.msra.mxu0 %v1215_v14  ;;  %921 = vmatpush3.msra.mxu1 %v1215_v14 }
  0x42   :  { %887 = vmatprep.subr.mxu0 %v1224_v15  ;;  %922 = vmatprep.subr.mxu1 %v1224_v15 }
  0x43   :  { %888 = vmatpush3.msra.mxu0 %v1224_v15  ;;  %889 = vmatprep.mubr.f32.mxu0 %v674_v20 }
  0x44   :  { %923 = vmatpush3.msra.mxu1 %v1224_v15  ;;  %924 = vmatprep.mubr.f32.mxu1 %v676_v21 }
  0x45   :  { %890 = vmatmul.mubr.f32.vlgmr.msra.gmra.mxu0 %v675_v22  ;;  %925 = vmatmul.mubr.f32.vlgmr.msra.gmra.mxu1 %v677_v23 }
  0x46   :  { %1006 = vset.pattern.permute.xlu1 %v1038_v26  ;;  %1004 = vset.pattern.permute.xlu0 %v1038_v26 }
  0x47   :  { %145 = vperm.xlu1 %1006, %v48_v24   ;;  %140 = vperm.xlu0 %1004, %v47_v25  }
  0x48   :  { %962 = vmatprep.subr.mxu1 %v457_v30  ;;  %927 = vmatprep.subr.mxu0 %v473_v31 }
  0x49   :  { %963 = vmatpush3.msra.mxu1 %v457_v30  ;;  %928 = vmatpush3.msra.mxu0 %v473_v31 }
  0x4a   :  { %964 = vmatprep.subr.mxu1 %v456_v32  ;;  %929 = vmatprep.subr.mxu0 %v472_v33 }
  0x4b   :  { %1007 = vset.pattern.permute.xlu1 %v1039_v27  ;;  %1005 = vset.pattern.permute.xlu0 %v1039_v27 }
  0x4c   :  { %241 = vperm.xlu1 %1007, %v48_v24   ;;  %237 = vperm.xlu0 %1005, %v47_v25  }
  0x4d   :  { %965 = vmatpush3.msra.mxu1 %v456_v32  ;;  %930 = vmatpush3.msra.mxu0 %v472_v33 }
  0x4e   :  { %966 = vmatprep.subr.mxu1 %v455_v34  ;;  %931 = vmatprep.subr.mxu0 %v471_v35 }
  0x4f   :  { %967 = vmatpush3.msra.mxu1 %v455_v34  ;;  %932 = vmatpush3.msra.mxu0 %v471_v35 }
  0x50   :  { %1008 = vset.pattern.permute.xlu1 %v1040_v28  ;;  %1009 = vset.pattern.permute.xlu0 %v1040_v28 }
  0x51   :  { %333 = vperm.xlu1 %1008, %v47_v25   ;;  %337 = vperm.xlu0 %1009, %v48_v24  }
  0x52   :  { %968 = vmatprep.subr.mxu1 %v454_v36  ;;  %933 = vmatprep.subr.mxu0 %v470_v37 }
  0x53   :  { %969 = vmatpush3.msra.mxu1 %v454_v36  ;;  %934 = vmatpush3.msra.mxu0 %v470_v37 }
  0x54   :  { %970 = vmatprep.subr.mxu1 %v453_v38  ;;  %935 = vmatprep.subr.mxu0 %v469_v39 }
  0x55   :  { %1010 = vset.pattern.permute.xlu1 %v1041_v29  ;;  %1011 = vset.pattern.permute.xlu0 %v1041_v29 }
  0x56   :  { %429 = vperm.xlu1 %1010, %v47_v25   ;;  %971 = vmatpush3.msra.mxu1 %v453_v38 }
  0x57   :  { %936 = vmatpush3.msra.mxu0 %v469_v39  ;;  %972 = vmatprep.subr.mxu1 %v452_v40 }
  0x58   :  { %937 = vmatprep.subr.mxu0 %v468_v41  ;;  %973 = vmatpush3.msra.mxu1 %v452_v40 }
  0x59   :  { %938 = vmatpush3.msra.mxu0 %v468_v41  ;;  %974 = vmatprep.subr.mxu1 %v451_v42 }
  0x5a   :  { %433 = vperm.xlu1 %1010, %v48_v24   ;;  %939 = vmatprep.subr.mxu0 %v467_v43 }
  0x5b   :  { %975 = vmatpush3.msra.mxu1 %v451_v42  ;;  %940 = vmatpush3.msra.mxu0 %v467_v43 }
  0x5c   :  { %976 = vmatprep.subr.mxu1 %v450_v44  ;;  %941 = vmatprep.subr.mxu0 %v466_v45 }
  0x5d   :  { %977 = vmatpush3.msra.mxu1 %v450_v44  ;;  %942 = vmatpush3.msra.mxu0 %v466_v45 }
  0x5e   :  { %978 = vmatprep.subr.mxu1 %v449_v46  ;;  %943 = vmatprep.subr.mxu0 %v465_v47 }
  0x5f   :  { %979 = vmatpush3.msra.mxu1 %v449_v46  ;;  %944 = vmatpush3.msra.mxu0 %v465_v47 }
  0x60   :  { %980 = vmatprep.subr.mxu1 %v448_v48  ;;  %945 = vmatprep.subr.mxu0 %v464_v49 }
  0x61   :  { %981 = vmatpush3.msra.mxu1 %v448_v48  ;;  %946 = vmatpush3.msra.mxu0 %v464_v49 }
  0x62   :  { %982 = vmatprep.subr.mxu1 %v447_v50  ;;  %947 = vmatprep.subr.mxu0 %v463_v51 }
  0x63   :  { %983 = vmatpush3.msra.mxu1 %v447_v50  ;;  %948 = vmatpush3.msra.mxu0 %v463_v51 }
  0x64   :  { %984 = vmatprep.subr.mxu1 %v446_v52  ;;  %949 = vmatprep.subr.mxu0 %v462_v53 }
  0x65   :  { %985 = vmatpush3.msra.mxu1 %v446_v52  ;;  %950 = vmatpush3.msra.mxu0 %v462_v53 }
  0x66   :  { %986 = vmatprep.subr.mxu1 %v445_v54  ;;  %951 = vmatprep.subr.mxu0 %v461_v55 }
  0x67   :  { %987 = vmatpush3.msra.mxu1 %v445_v54  ;;  %952 = vmatpush3.msra.mxu0 %v461_v55 }
  0x68   :  { %988 = vmatprep.subr.mxu1 %v444_v56  ;;  %953 = vmatprep.subr.mxu0 %v460_v57 }
  0x69   :  { %989 = vmatpush3.msra.mxu1 %v444_v56  ;;  %954 = vmatpush3.msra.mxu0 %v460_v57  ;;  %v678_v57 = vld [vmem:[%s1446_s7] ss:$0 sm:$0xff]  ;;  %s660_s7 = sshll.u32 %s1042_s6, 4  ;;  %s661_s7 = int_to_ptr.vmem [resolvable:$true] %s660_s7 }
  0x6a   :  { %990 = vmatprep.subr.mxu1 %v443_v58  ;;  %955 = vmatprep.subr.mxu0 %v459_v59  ;;  %s1016_s28 = scalar_lea.vmem %s661_s7, 256  ;;  %p1021_p1 = scmp.lt.s32.totalorder %s661_s7, %s661_s7 }
  0x6b   :  { %991 = vmatpush3.msra.mxu1 %v443_v58  ;;  %956 = vmatpush3.msra.mxu0 %v459_v59  ;;  %p1017_p0 = scmp.ne.s32.totalorder %s661_s7, %s1016_s28  ;;  %p1022_p2 = scmp.lt.s32.totalorder %s1016_s28, %s1016_s28 }
  0x6c   :  { %992 = vmatprep.subr.mxu1 %v442_v60  ;;  %994 = vmatprep.mubr.f32.mxu1 %v440_v61 }
  0x6d   :  { %993 = vmatpush3.msra.mxu1 %v442_v60  ;;  %957 = vmatprep.subr.mxu0 %v458_v62  ;;  %p1023_p3 = por %p1022_p2, %p1021_p1 }
  0x6e   :  { %995 = vmatmul.mubr.f32.vlgmr.msra.gmra.mxu1 %v441_v63  ;;  %958 = vmatpush3.msra.mxu0 %v458_v62 }
  0x6f   :  { %p1024_p4 = pnand %p1023_p3, %p1017_p0 }
  0xc2   :  { %v146_v1 = vpop.permute.xlu1 %145  ;;  %v141_v11 = vpop.permute.xlu0 %140 }
  0xc7   :  { %v242_v8 = vpop.permute.xlu1 %241  ;;  %v238_v19 = vpop.permute.xlu0 %237 }
  0xcc   :  { %v334_v14 = vpop.permute.xlu1 %333  ;;  %v338_v37 = vpop.permute.xlu0 %337 }
  0xd1   :  { %v430_v26 = vpop.permute.xlu1 %429 }
  0xd5   :  { %v434_v47 = vpop.permute.xlu1 %433 }
  0xe3   :  { %v821_v0 = vpop.f32.mrf.mxu0  ;;  %v856_v2 = vpop.f32.mrf.mxu1 }
  0xe4   :  { %v129_v6 = vadd.f32 %v821_v0, %v671_v3  ;;  %v227_v7 = vadd.f32 %v856_v2, %v671_v3 }
  0xe5   :  { %v123_v4 = vpop.f32.mrf.mxu0  ;;  %v221_v5 = vpop.f32.mrf.mxu1 }
  0xe6   :  { %v124_v9 = vadd.f32 %v671_v3, %v123_v4  ;;  %v222_v10 = vadd.f32 %v671_v3, %v221_v5  ;;  %v135_v12 = vmul.f32 0.01, %v129_v6  ;;  %v233_v13 = vmul.f32 0.01, %v227_v7 }
  0xe7   :  { %vm133_vm0 = vcmp.ge.f32.partialorder %v129_v6, 0.0  ;;  %vm231_vm1 = vcmp.ge.f32.partialorder %v227_v7, 0.0 }
  0xe8   :  { %v134_v15 = vmul.f32 0.01, %v124_v9  ;;  %v232_v16 = vmul.f32 0.01, %v222_v10  ;;  %vm132_vm2 = vcmp.ge.f32.partialorder %v124_v9, 0.0  ;;  %vm230_vm3 = vcmp.ge.f32.partialorder %v222_v10, 0.0 }
  0xe9   :  { %v137_v17 = vsel %vm133_vm0, %v129_v6, %v135_v12  ;;  %v235_v18 = vsel %vm231_vm1, %v227_v7, %v233_v13 }
  0xea   :  { %v136_v20 = vsel %vm132_vm2, %v124_v9, %v134_v15  ;;  %v234_v23 = vsel %vm230_vm3, %v222_v10, %v232_v16  ;;  %v149_v27 = vmul.f32 %v146_v1, %v137_v17  ;;  %v245_v28 = vmul.f32 %v242_v8, %v235_v18 }
  0xeb   :  { %v148_v31 = vmul.f32 %v141_v11, %v136_v20  ;;  %v244_v35 = vmul.f32 %v238_v19, %v234_v23 }
  0xec   :  { %v247_v41 = vadd.f32 %v245_v28, %v149_v27 }
  0xed   :  { %v246_v45 = vadd.f32 %v244_v35, %v148_v31 }
 0x105   :  { %v891_v21 = vpop.f32.mrf.mxu0  ;;  %v926_v22 = vpop.f32.mrf.mxu1 }
 0x106   :  { %v323_v24 = vadd.f32 %v891_v21, %v671_v3  ;;  %v419_v25 = vadd.f32 %v926_v22, %v671_v3 }
 0x107   :  { %v317_v29 = vpop.f32.mrf.mxu0  ;;  %v413_v30 = vpop.f32.mrf.mxu1 }
 0x108   :  { %v329_v32 = vmul.f32 0.01, %v323_v24  ;;  %v318_v33 = vadd.f32 %v671_v3, %v317_v29  ;;  %v414_v34 = vadd.f32 %v671_v3, %v413_v30  ;;  %v425_v36 = vmul.f32 0.01, %v419_v25 }
 0x109   :  { %vm423_vm4 = vcmp.ge.f32.partialorder %v419_v25, 0.0  ;;  %vm327_vm5 = vcmp.ge.f32.partialorder %v323_v24, 0.0 }
 0x10a   :  { %vm326_vm6 = vcmp.ge.f32.partialorder %v318_v33, 0.0  ;;  %v328_v38 = vmul.f32 0.01, %v318_v33  ;;  %vm422_vm7 = vcmp.ge.f32.partialorder %v414_v34, 0.0  ;;  %v424_v39 = vmul.f32 0.01, %v414_v34 }
 0x10b   :  { %v331_v40 = vsel %vm327_vm5, %v323_v24, %v329_v32  ;;  %v427_v48 = vsel %vm423_vm4, %v419_v25, %v425_v36 }
 0x10c   :  { %v330_v42 = vsel %vm326_vm6, %v318_v33, %v328_v38  ;;  %v426_v43 = vsel %vm422_vm7, %v414_v34, %v424_v39  ;;  %v341_v44 = vmul.f32 %v338_v37, %v331_v40  ;;  %v437_v52 = vmul.f32 %v434_v47, %v427_v48 }
 0x10d   :  { %v340_v46 = vmul.f32 %v334_v14, %v330_v42  ;;  %v436_v51 = vmul.f32 %v430_v26, %v426_v43 }
 0x10e   :  { %v343_v49 = vadd.f32 %v341_v44, %v247_v41 }
 0x10f   :  { %v342_v50 = vadd.f32 %v340_v46, %v246_v45 }
 0x110   :  { %v439_v54 = vadd.f32 %v437_v52, %v343_v49 }
 0x111   :  { %v438_v53 = vadd.f32 %v436_v51, %v342_v50 }
 0x113   :  { %959 = vmatprep.mubr.f32.mxu0 %v438_v53 }
 0x114   :  { %960 = vmatmul.mubr.f32.vlgmr.msra.gmra.mxu0 %v439_v54 }
 0x12e   :  { %v996_v55 = vpop.f32.mrf.mxu1 }
 0x130   :  { %v615_v59 = vpop.f32.mrf.mxu1 }
 0x1d4   :  { %v961_v56 = vpop.f32.mrf.mxu0 }
 0x1d5   :  { %v621_v58 = vadd.f32 %v996_v55, %v961_v56 }
 0x1d6   :  { %v540_v60 = vpop.f32.mrf.mxu0 }
 0x1d7   :  { %v632_v61 = vadd.f32 %v678_v57, %v621_v58  ;;  %v616_v62 = vadd.f32 %v615_v59, %v540_v60 }
 0x1d9   :  { %v631_v63 = vadd.f32 %v678_v57, %v616_v62  ;;  %vm634_vm8 = vcmp.ge.f32.partialorder %v632_v61, 0.0  ;;  %v636_v0 = vmul.f32 0.01, %v632_v61 }
 0x1db   :  { %v638_v1 = vsel %vm634_vm8, %v632_v61, %v636_v0  ;;  %vm633_vm9 = vcmp.ge.f32.partialorder %v631_v63, 0.0  ;;  %v635_v2 = vmul.f32 0.01, %v631_v63 }
 0x1dc   :  { %v640_v3 = vmul.f32 %v638_v1, %v638_v1 }
 0x1dd   :  { %v637_v4 = vsel %vm633_vm9, %v631_v63, %v635_v2 }
 0x1de   :  { %643 = vadd.xlane.f32.xlu1 %v640_v3  ;;  %v639_v5 = vmul.f32 %v637_v4, %v637_v4 }
 0x1e0   :  { %641 = vadd.xlane.f32.xlu0 %v639_v5 }
 0x267   :  { %v644_v6 = vpop.xlane.xlu1 %643 }
 0x268   :  { %vm646_vm10 = vcmp.eq.f32.partialorder %v644_v6, 0.0 }
 0x269   :  { %v648_v7 = vsel %vm646_vm10, 1.0, %v644_v6  ;;  %v642_v8 = vpop.xlane.xlu0 %641 }
 0x26a   :  { %1012 = vrsqrt.f32 %v648_v7  ;;  %vm645_vm11 = vcmp.eq.f32.partialorder %v642_v8, 0.0 }
 0x26b   :  { %v647_v9 = vsel %vm645_vm11, 1.0, %v642_v8 }
 0x26c   :  { %1014 = vrsqrt.f32 %v647_v9 }
 0x277   :  { %v1013_v10 = vpop.eup %1012 }
 0x278   :  { %v652_v11 = vmul.f32 %v1013_v10, %v638_v1 }
 0x279   :  { %v1015_v12 = vpop.eup %1014 }
 0x27a   :  { %v651_v13 = vmul.f32 %v1015_v12, %v637_v4  ;;  %654 = vst [vmem:[#allocation2 + $0x8] sm:$0xff] %v652_v11 }
 0x27c   :  { %653 = vst [vmem:[#allocation2] sm:$0xff] %v651_v13 }
 0x27d   :  { %1027 = shalt.err (!%p1024_p4)
}
 0x27e   :  { %s1043_s29 = smov 128   ;;  %s1044_s30 = smov 8  }
 0x27f   :  { %666 = dma.vmem_to_hbm [thread:$0]  %s661_s7, 256, %s1447_s8, [#allocation3], %s1043_s29, %s1043_s29, %s1044_s30  }
 0x280   :  { %1036 = dma.done.wait [#allocation3], 256  }
 0x281   :  { %1037 = vsyncadd [#allocation3], 4294967040 }
 0x282   :  { %670 = vsyncpa [#allocation3], 1 }

</bundles_post_ra>
